<compile_context>
chip_gen: v6e
topology: v6e:2x2x1
jax: 0.10.0
libtpu: 0.0.40
codegen_flags: <defaults>
</compile_context>

<pallas_src>
import numpy as np

import jax
import jax.numpy as jnp
from jax.experimental import pallas as pl
from jax.experimental.pallas import tpu as pltpu


# ---------------------------------------------------------------------------
# Tuning constants (safe across v5e / v6e / v7x)
# ---------------------------------------------------------------------------
_TARGET_TILE_BYTES = 2 * 2**20        # ~2 MiB per output buffer: >=85% HBM roofline
_VMEM_FOOTPRINT_BUDGET = 40 * 2**20   # all buffers, double-buffered (v7x has 64 MiB)
_VMEM_LIMIT_BYTES = 48 * 2**20        # above v5e's 16 MiB scoped default


def _round8(x: int) -> int:
    return max(8, (x // 8) * 8)


# ---------------------------------------------------------------------------
# Kernels
# ---------------------------------------------------------------------------
def _make_add_kernel(num_inputs: int, acc_dtype):
    """Elementwise sum of `num_inputs` identically-shaped VMEM tiles."""

    def kernel(*refs):
        out_ref = refs[num_inputs]
        acc = refs[0][...].astype(acc_dtype)
        for i in range(1, num_inputs):
            acc = acc + refs[i][...].astype(acc_dtype)
        out_ref[...] = acc.astype(out_ref.dtype)

    return kernel


def _make_flat_concat_kernel(widths):
    """Copy each (bn, C_i*HW) input tile into its lane-slice of the output.

    All slices are static; when HW % 128 == 0 every offset is 128-aligned so
    stores lower to full-lane unmasked vst (no sublane shifts, no vst.msk).
    """
    k = len(widths)

    def kernel(*refs):
        out_ref = refs[k]
        off = 0
        for i, w in enumerate(widths):
            out_ref[:, off:off + w] = refs[i][:, :]
            off += w

    return kernel


def _make_concat3d_kernel(channels):
    """Fallback: (1, C_i, bc) -> channel slice of (1, C_total, bc)."""
    k = len(channels)

    def kernel(*refs):
        out_ref = refs[k]
        off = 0
        for i, c in enumerate(channels):
            out_ref[0, off:off + c, :] = refs[i][0, :, :]
            off += c

    return kernel


# ---------------------------------------------------------------------------
# Layout helpers
# ---------------------------------------------------------------------------
def _flatten_2d(total: int):
    """Lane-dense 2-D factorization of a flat size.

    Returns (rows, lanes, pad_elems).  pad_elems > 0 only when `total` is not
    divisible by any power-of-two lane width >= 128; in that case we pad to a
    multiple of 128 lanes instead of degenerating to a 1-sublane layout.
    """
    for lanes in (1024, 512, 2048, 256, 128):
        if total % lanes == 0 and total // lanes >= 8:
            return total // lanes, lanes, 0
    for lanes in (1024, 512, 256, 128):
        if total % lanes == 0:
            return total // lanes, lanes, 0
    lanes = 128
    rows = -(-total // lanes)
    return rows, lanes, rows * lanes - total


# ---------------------------------------------------------------------------
# mode = 'add'
# ---------------------------------------------------------------------------
def _merge_add(xs):
    shape = xs[0].shape
    dtype = xs[0].dtype
    for x in xs:
        assert x.shape == shape, "add mode requires identical shapes"
        assert x.dtype == dtype, "add mode requires identical dtypes"

    k = len(xs)
    total = int(np.prod(shape))
    rows, lanes, pad = _flatten_2d(total)
    if pad:
        flat = [jnp.pad(x.reshape(-1), (0, pad)) for x in xs]
    else:
        flat = [x.reshape(-1) for x in xs]
    xs2 = [x.reshape(rows, lanes) for x in flat]

    itemsize = jnp.dtype(dtype).itemsize
    row_bytes = lanes * itemsize

    # Full lane-width blocks; tile only the row axis (contiguous HBM DMAs).
    br = min(rows, max(1, _TARGET_TILE_BYTES // row_bytes))
    if br < rows:
        br = _round8(br)
        if br >= rows:
            br = rows
    if br == rows and rows >= 16:
        br = _round8(rows // 2)          # >= 2 grid steps for v7x megacore
    # Unconditional VMEM guard: k inputs + 1 output, double-buffered.
    while br > 8 and (k + 1) * 2 * br * row_bytes > _VMEM_FOOTPRINT_BUDGET:
        br = _round8(br // 2)

    grid = (pl.cdiv(rows, br),)
    spec = pl.BlockSpec((br, lanes), lambda i: (i, 0))
    acc_dtype = jnp.float32 if jnp.issubdtype(dtype, jnp.floating) else dtype

    out2 = pl.pallas_call(
        _make_add_kernel(k, acc_dtype),
        out_shape=jax.ShapeDtypeStruct((rows, lanes), dtype),
        grid=grid,
        in_specs=[spec] * k,
        out_specs=spec,
        compiler_params=pltpu.CompilerParams(
            dimension_semantics=("parallel",),
            vmem_limit_bytes=_VMEM_LIMIT_BYTES),
    )(*xs2)

    if pad:
        return out2.reshape(-1)[:total].reshape(shape)
    return out2.reshape(shape)


# ---------------------------------------------------------------------------
# mode = 'concat' (along dim 1)
# ---------------------------------------------------------------------------
def _merge_concat(xs):
    dtype = xs[0].dtype
    N = int(xs[0].shape[0])
    trailing = xs[0].shape[2:]
    HW = int(np.prod(trailing)) if trailing else 1

    channels = []
    for x in xs:
        assert x.dtype == dtype, "concat mode requires identical dtypes"
        assert x.shape[0] == N and x.shape[2:] == trailing, \
            "concat mode requires matching batch/spatial dims"
        channels.append(int(x.shape[1]))
    c_total = sum(channels)
    itemsize = jnp.dtype(dtype).itemsize

    widths = [c * HW for c in channels]
    F_out = c_total * HW
    out_row_bytes = F_out * itemsize

    def flat_footprint(bn):
        # inputs sum to F_out lanes + output F_out lanes, double-buffered
        return 2 * 2 * F_out * itemsize * bn

    # Choose a batch block: big enough to amortize per-step overhead, small
    # enough for the VMEM budget, >= 2 grid steps when the batch allows it.
    bn = min(N, max(1, _TARGET_TILE_BYTES // out_row_bytes))
    if bn >= N and N >= 16:
        bn = N // 2
    if bn < N:
        bn = _round8(bn)
        if bn >= N:
            bn = N
    while bn > 8 and flat_footprint(bn) > _VMEM_FOOTPRINT_BUDGET:
        bn = _round8(bn // 2)

    if flat_footprint(bn) <= _VMEM_FOOTPRINT_BUDGET:
        # ---- Fast path: flat per-batch layout, lane-aligned full-width stores.
        xs2 = [x.reshape(N, w) for x, w in zip(xs, widths)]
        grid = (pl.cdiv(N, bn),)
        in_specs = [pl.BlockSpec((bn, w), lambda b: (b, 0)) for w in widths]
        out_spec = pl.BlockSpec((bn, F_out), lambda b: (b, 0))

        out2 = pl.pallas_call(
            _make_flat_concat_kernel(widths),
            out_shape=jax.ShapeDtypeStruct((N, F_out), dtype),
            grid=grid,
            in_specs=in_specs,
            out_specs=out_spec,
            compiler_params=pltpu.CompilerParams(
                dimension_semantics=("parallel",),
                vmem_limit_bytes=_VMEM_LIMIT_BYTES),
        )(*xs2)
        return out2.reshape((N, c_total) + trailing)

    # ---- Fallback: flat per-batch row too large for VMEM.  Use the 3-D
    # (N, C, HW) layout and tile the spatial axis in 128-lane chunks.  This
    # path does sublane channel-slice copies (masked when C_i is not a
    # multiple of the sublane pack) but only triggers for very large maps.
    xs3 = [x.reshape(N, c, HW) for x, c in zip(xs, channels)]
    pack = max(8, 32 // itemsize)                       # f32:8  bf16:16  i8:32
    c_pad = (sum(-(-c // pack) * pack for c in channels)
             + -(-c_total // pack) * pack)              # padded in + out channels

    bc = HW
    if HW > 128:
        bc = max(128, (_TARGET_TILE_BYTES // (c_total * itemsize)) // 128 * 128)
        bc = min(bc, (HW // 128) * 128)
        while bc > 128 and 2 * c_pad * bc * itemsize > _VMEM_FOOTPRINT_BUDGET:
            bc = max(128, (bc // 2) // 128 * 128)

    grid = (N, pl.cdiv(HW, bc))
    in_specs = [pl.BlockSpec((1, c, bc), lambda n, j: (n, 0, j))
                for c in channels]
    out_spec = pl.BlockSpec((1, c_total, bc), lambda n, j: (n, 0, j))

    out3 = pl.pallas_call(
        _make_concat3d_kernel(channels),
        out_shape=jax.ShapeDtypeStruct((N, c_total, HW), dtype),
        grid=grid,
        in_specs=in_specs,
        out_specs=out_spec,
        compiler_params=pltpu.CompilerParams(
            dimension_semantics=("parallel", "parallel"),
            vmem_limit_bytes=_VMEM_LIMIT_BYTES),
    )(*xs3)
    return out3.reshape((N, c_total) + trailing)


# ---------------------------------------------------------------------------
# Wrapper (the `Merge` forward)
# ---------------------------------------------------------------------------
def merge(xs, mode: str = "concat"):
    """Pallas equivalent of Merge(mode)(xs) for a list of NCHW arrays."""
    assert mode in ("concat", "add")
    assert len(xs) >= 1
    if mode == "add":
        return _merge_add(xs)
    return _merge_concat(xs)


# ---------------------------------------------------------------------------
# Demo / correctness check
# ---------------------------------------------------------------------------
if __name__ == "__main__":
    key = jax.random.PRNGKey(0)
    k0, k1, k2 = jax.random.split(key, 3)

    # Three NCHW feature maps: batch=2, channels=4, spatial=16x16.
    x0 = jax.random.normal(k0, (2, 4, 16, 16), dtype=jnp.float32)
    x1 = jax.random.normal(k1, (2, 4, 16, 16), dtype=jnp.float32)
    x2 = jax.random.normal(k2, (2, 4, 16, 16), dtype=jnp.float32)
    xs = [x0, x1, x2]

    # mode='concat'
    out_cat = merge(xs, mode="concat")
    jax.block_until_ready(out_cat)
    ref_cat = jnp.concatenate(xs, axis=1)
    np.testing.assert_allclose(np.asarray(out_cat), np.asarray(ref_cat),
                               rtol=1e-6, atol=1e-6)
    assert out_cat.shape == (2, 12, 16, 16)

    # mode='add'
    out_add = merge(xs, mode="add")
    jax.block_until_ready(out_add)
    ref_add = x0 + x1 + x2
    np.testing.assert_allclose(np.asarray(out_add), np.asarray(ref_add),
                               rtol=1e-6, atol=1e-6)
    assert out_add.shape == (2, 4, 16, 16)

    print("KERNEL_OK")
</pallas_src>

<mosaic_0001>
module attributes {stable_mosaic.version = 11 : i64} {
  func.func @kernel(%arg0: i32, %arg1: memref<2x1024xf32, #tpu.memory_space<vmem>>, %arg2: memref<2x1024xf32, #tpu.memory_space<vmem>>, %arg3: memref<2x1024xf32, #tpu.memory_space<vmem>>, %arg4: memref<2x3072xf32, #tpu.memory_space<vmem>>) attributes {dimension_semantics = [#tpu.dimension_semantics<parallel>], iteration_bounds = array<i64: 1>, scalar_prefetch = 0 : i64, scratch_operands = 0 : i64, tpu.core_type = #tpu.core_type<tc>, window_params = [{transform_indices = @transform_0, window_bounds = array<i64: 2, 1024>}, {transform_indices = @transform_1, window_bounds = array<i64: 2, 1024>}, {transform_indices = @transform_2, window_bounds = array<i64: 2, 1024>}, {transform_indices = @transform_3, window_bounds = array<i64: 2, 3072>}]} {
    %c0 = arith.constant 0 : index
    %c0_0 = arith.constant 0 : index
    %0 = vector.load %arg1[%c0, %c0_0] : memref<2x1024xf32, #tpu.memory_space<vmem>>, vector<2x1024xf32>
    %c0_1 = arith.constant 0 : index
    %c0_2 = arith.constant 0 : index
    %1 = vector.load %arg4[%c0_1, %c0_2] : memref<2x3072xf32, #tpu.memory_space<vmem>>, vector<2x1024xf32>
    tpu.vector_store %arg4[%c0_1, %c0_2], %0 {strides = array<i32>} : memref<2x3072xf32, #tpu.memory_space<vmem>>, vector<2x1024xf32>,
    %c0_3 = arith.constant 0 : index
    %c0_4 = arith.constant 0 : index
    %2 = vector.load %arg2[%c0_3, %c0_4] : memref<2x1024xf32, #tpu.memory_space<vmem>>, vector<2x1024xf32>
    %c0_5 = arith.constant 0 : index
    %c1024 = arith.constant 1024 : index
    %3 = vector.load %arg4[%c0_5, %c1024] : memref<2x3072xf32, #tpu.memory_space<vmem>>, vector<2x1024xf32>
    tpu.vector_store %arg4[%c0_5, %c1024], %2 {strides = array<i32>} : memref<2x3072xf32, #tpu.memory_space<vmem>>, vector<2x1024xf32>,
    %c0_6 = arith.constant 0 : index
    %c0_7 = arith.constant 0 : index
    %4 = vector.load %arg3[%c0_6, %c0_7] : memref<2x1024xf32, #tpu.memory_space<vmem>>, vector<2x1024xf32>
    %c0_8 = arith.constant 0 : index
    %c2048 = arith.constant 2048 : index
    %5 = vector.load %arg4[%c0_8, %c2048] : memref<2x3072xf32, #tpu.memory_space<vmem>>, vector<2x1024xf32>
    tpu.vector_store %arg4[%c0_8, %c2048], %4 {strides = array<i32>} : memref<2x3072xf32, #tpu.memory_space<vmem>>, vector<2x1024xf32>,
    return
  }
  func.func @transform_0(%arg0: i32) -> (i32, i32) {
    %c0_i32 = arith.constant 0 : i32
    %c0_i32_0 = arith.constant 0 : i32
    return %arg0, %c0_i32 : i32, i32
  }
  func.func @transform_1(%arg0: i32) -> (i32, i32) {
    %c0_i32 = arith.constant 0 : i32
    %c0_i32_0 = arith.constant 0 : i32
    return %arg0, %c0_i32 : i32, i32
  }
  func.func @transform_2(%arg0: i32) -> (i32, i32) {
    %c0_i32 = arith.constant 0 : i32
    %c0_i32_0 = arith.constant 0 : i32
    return %arg0, %c0_i32 : i32, i32
  }
  func.func @transform_3(%arg0: i32) -> (i32, i32) {
    %c0_i32 = arith.constant 0 : i32
    %c0_i32_0 = arith.constant 0 : i32
    return %arg0, %c0_i32 : i32, i32
  }
}

</mosaic_0001>

<bundles_post_ra>
// kernel: tpu_custom_call.1
= control target key start
LH: loop header
LB: loop body
LE: loop exit
PB: predicated region body
PF: predicated region fallthrough
CT: control target
= control target key end

     0   :  { %8 = vsyncpa [#allocation3], 0  ;;  %s204_s0 = inlined_call_operand.hbm [shape: f32[2,1024], index: 0, kind: input, shape index: {}]   ;;  %s205_s1 = inlined_call_operand.hbm [shape: f32[2,1024], index: 1, kind: input, shape index: {}]   ;;  %s206_s2 = inlined_call_operand.hbm [shape: f32[2,1024], index: 2, kind: input, shape index: {}]   ;;  %s207_s3 = inlined_call_operand.hbm [shape: f32[2,3072], index: 3, kind: output, shape index: {}]  }
   0x1   :  { %9 = vsyncpa [#allocation6], 0 }
   0x2   :  { %10 = vsyncpa [#allocation4], 0  ;;  %s168_s12 = smov [#allocation5]   ;;  %s169_s14 = smov [#allocation2]  }
   0x3   :  { %s27_s13 = sshll.u32 %s168_s12, 4  ;;  %s17_s15 = sshll.u32 %s169_s14, 4  ;;  %s28_s13 = int_to_ptr.vmem [resolvable:$true] %s27_s13  ;;  %s18_s15 = int_to_ptr.vmem [resolvable:$true] %s17_s15 }
   0x4   :  { %s90_s16 = scalar_lea.vmem %s28_s13, 256  ;;  %p95_p1 = scmp.lt.s32.totalorder %s28_s13, %s28_s13 }
   0x5   :  { %p91_p0 = scmp.ne.s32.totalorder %s28_s13, %s90_s16  ;;  %p96_p2 = scmp.lt.s32.totalorder %s90_s16, %s90_s16 }
   0x7   :  { %p97_p3 = por %p96_p2, %p95_p1 }
   0x9   :  { %p98_p4 = pnand %p97_p3, %p91_p0 }
   0xb   :  { %101 = shalt.err (!%p98_p4)
}
   0xc   :  { %30 = dma.hbm_to_vmem [thread:$0]  %s205_s1, 256, %s28_s13, [#allocation6]  }
   0xd   :  { %s110_s19 = scalar_lea.vmem %s18_s15, 256  ;;  %p115_p6 = scmp.lt.s32.totalorder %s18_s15, %s18_s15 }
   0xe   :  { %p111_p5 = scmp.ne.s32.totalorder %s18_s15, %s110_s19  ;;  %p116_p7 = scmp.lt.s32.totalorder %s110_s19, %s110_s19 }
  0x10   :  { %p117_p8 = por %p116_p7, %p115_p6 }
  0x12   :  { %p118_p9 = pnand %p117_p8, %p111_p5 }
  0x14   :  { %121 = shalt.err (!%p118_p9)
}
  0x15   :  { %20 = dma.hbm_to_vmem [thread:$0]  %s204_s0, 256, %s18_s15, [#allocation3]  }
  0x16   :  { %s170_s22 = smov [#allocation7]  }
  0x17   :  { %s37_s23 = sshll.u32 %s170_s22, 4  ;;  %s38_s23 = int_to_ptr.vmem [resolvable:$true] %s37_s23 }
  0x18   :  { %s130_s24 = scalar_lea.vmem %s38_s23, 256  ;;  %p135_p11 = scmp.lt.s32.totalorder %s38_s23, %s38_s23 }
  0x19   :  { %p131_p10 = scmp.ne.s32.totalorder %s38_s23, %s130_s24  ;;  %p136_p12 = scmp.lt.s32.totalorder %s130_s24, %s130_s24 }
  0x1b   :  { %p137_p13 = por %p136_p12, %p135_p11 }
  0x1d   :  { %p138_p0 = pnand %p137_p13, %p131_p10 }
  0x1f   :  { %141 = shalt.err (!%p138_p0)
}
  0x20   :  { %40 = dma.hbm_to_vmem [thread:$0]  %s206_s2, 256, %s38_s23, [#allocation6]  }
  0x21   :  { %162 = dma.done.wait [#allocation3], 256  }
  0x22   :  { %163 = vsyncadd [#allocation3], 4294967040 }
  0x23   :  { %164 = dma.done.wait [#allocation6], 512  }
  0x24   :  { %165 = vsyncadd [#allocation6], 4294966784  ;;  %s171_s26 = smov [#allocation8]   ;;  %v50_v0 = vld [vmem:[#allocation2] sm:$0xff]  ;;  %v51_v1 = vld [vmem:[#allocation2 + $0x8] sm:$0xff] }
  0x25   :  { %s68_s0 = sshll.u32 %s171_s26, 4  ;;  %v54_v2 = vld [vmem:[#allocation5] sm:$0xff]  ;;  %52 = vst [vmem:[#allocation8] sm:$0xff] %v50_v0  ;;  %53 = vst [vmem:[#allocation8 + $0x8] sm:$0xff] %v51_v1  ;;  %v55_v3 = vld [vmem:[#allocation5 + $0x8] sm:$0xff]  ;;  %s69_s0 = int_to_ptr.vmem [resolvable:$true] %s68_s0 }
  0x26   :  { %56 = vst [vmem:[#allocation8 + $0x10] sm:$0xff] %v54_v2  ;;  %v58_v4 = vld [vmem:[#allocation7] sm:$0xff]  ;;  %v59_v5 = vld [vmem:[#allocation7 + $0x8] sm:$0xff]  ;;  %57 = vst [vmem:[#allocation8 + $0x18] sm:$0xff] %v55_v3  ;;  %s142_s2 = scalar_lea.vmem %s69_s0, 768  ;;  %p147_p2 = scmp.lt.s32.totalorder %s69_s0, %s69_s0 }
  0x27   :  { %60 = vst [vmem:[#allocation8 + $0x20] sm:$0xff] %v58_v4  ;;  %61 = vst [vmem:[#allocation8 + $0x28] sm:$0xff] %v59_v5  ;;  %p143_p1 = scmp.ne.s32.totalorder %s69_s0, %s142_s2  ;;  %p148_p3 = scmp.lt.s32.totalorder %s142_s2, %s142_s2 }
  0x29   :  { %p149_p4 = por %p148_p3, %p147_p2 }
  0x2b   :  { %p150_p5 = pnand %p149_p4, %p143_p1 }
  0x2d   :  { %153 = shalt.err (!%p150_p5)
}
  0x2e   :  { %71 = dma.vmem_to_hbm [thread:$0]  %s69_s0, 768, %s207_s3, [#allocation4]  }
  0x2f   :  { %166 = dma.done.wait [#allocation4], 768  }
  0x30   :  { %167 = vsyncadd [#allocation4], 4294966528 }
  0x31   :  { %75 = vsyncpa [#allocation3], 1 }
  0x32   :  { %76 = vsyncpa [#allocation6], 1 }
  0x33   :  { %77 = vsyncpa [#allocation4], 1 }

</bundles_post_ra>
